<compile_context>
chip_gen: v6e
topology: v6e:2x2x1
jax: 0.10.0
libtpu: 0.0.40
codegen_flags: <defaults>
</compile_context>

<pallas_src>
import jax
import jax.numpy as jnp
from jax.experimental import pallas as pl
from jax.experimental.pallas import tpu as pltpu

IN_FEATURES = 52  # fixed by nn.Linear(52, 1)


def _rghead_kernel(x_ref, w_ref, b_ref, o_ref):
    # x_ref: (B, C, TL) f32   w_ref: (C, 1) f32   b_ref: (1, 1) f32   o_ref: (B, TL) f32
    x = x_ref[...]                                   # (B, C, TL)
    w = w_ref[...]                                   # (C, 1)
    # Weighted sum over the channel (sublane) axis: VPU multiply + cross-sublane reduce.
    acc = jnp.sum(x * w[None, :, :], axis=1)         # (B, TL)
    o_ref[...] = acc + b_ref[...]                    # (1, 1) bias broadcasts over (B, TL)


def rghead_forward(x: jax.Array, weight: jax.Array, bias: jax.Array) -> jax.Array:
    """Pallas equivalent of RGHead.forward.

    x:      (B, 52, L) float32
    weight: (1, 52)    float32  (nn.Linear(52, 1).weight layout)
    bias:   (1,)       float32
    returns np.squeeze(linear(x.permute(0, 2, 1)))  -> usually (B, L)
    """
    B, C, L = x.shape
    assert C == IN_FEATURES, "channel dim must match nn.Linear(52, 1)"
    assert weight.shape == (1, C) and bias.shape == (1,)

    # Column-shaped weight and 2-D bias so everything in-kernel stays >= 2-D.
    w_col = weight.reshape(C, 1).astype(jnp.float32)
    b_2d = bias.reshape(1, 1).astype(jnp.float32)

    # Tile the sequence (lane) axis. Large, 128-aligned L gets 512-wide tiles
    # (unmasked vst, double-buffered output, bounded VMEM on v5e/v7x); tiny or
    # ragged L falls back to a single full-extent block (allowed by the
    # (8, 128) rule since block dims equal the array dims).
    if L % 128 == 0 and L > 512:
        tile_l = 512
    else:
        tile_l = L
    grid = (pl.cdiv(L, tile_l),)

    out = pl.pallas_call(
        _rghead_kernel,
        out_shape=jax.ShapeDtypeStruct((B, L), jnp.float32),
        grid_spec=pltpu.PrefetchScalarGridSpec(
            num_scalar_prefetch=0,
            grid=grid,
            in_specs=[
                pl.BlockSpec((B, C, tile_l), lambda i: (0, 0, i)),
                pl.BlockSpec((C, 1), lambda i: (0, 0)),   # weight: resident across tiles
                pl.BlockSpec((1, 1), lambda i: (0, 0)),   # bias:   resident across tiles
            ],
            out_specs=pl.BlockSpec((B, tile_l), lambda i: (0, i)),
        ),
        compiler_params=pltpu.CompilerParams(
            dimension_semantics=("parallel",),
        ),
    )(x.astype(jnp.float32), w_col, b_2d)

    # Match np.squeeze: drop every size-1 dim of the (B, L, 1) linear output.
    return jnp.squeeze(out)


if __name__ == "__main__":
    key = jax.random.PRNGKey(0)
    kx, kw, kb = jax.random.split(key, 3)

    B, C, L = 2, IN_FEATURES, 16
    x = jax.random.normal(kx, (B, C, L), dtype=jnp.float32)
    weight = jax.random.normal(kw, (1, C), dtype=jnp.float32) / jnp.sqrt(C)
    bias = jax.random.normal(kb, (1,), dtype=jnp.float32)

    out = rghead_forward(x, weight, bias)
    out = jax.block_until_ready(out)

    # Pure-JAX reference mirroring the PyTorch forward (permute -> linear -> squeeze).
    x_perm = jnp.transpose(x, (0, 2, 1))                               # (B, L, C)
    ref = jnp.einsum("blc,oc->blo", x_perm, weight,
                     precision=jax.lax.Precision.HIGHEST) + bias       # (B, L, 1)
    ref = jnp.squeeze(ref)                                             # (B, L)

    assert out.shape == ref.shape == (B, L)
    assert out.dtype == jnp.float32
    assert jnp.allclose(out, ref, atol=1e-5, rtol=1e-5)

    print("KERNEL_OK")
</pallas_src>

<mosaic_0001>
module attributes {stable_mosaic.version = 11 : i64} {
  func.func @_rghead_kernel(%arg0: i32, %arg1: memref<2x52x16xf32, #tpu.memory_space<vmem>>, %arg2: memref<52x1xf32, #tpu.memory_space<vmem>>, %arg3: memref<1x1xf32, #tpu.memory_space<vmem>>, %arg4: memref<2x16xf32, #tpu.memory_space<vmem>>) attributes {dimension_semantics = [#tpu.dimension_semantics<parallel>], iteration_bounds = array<i64: 1>, scalar_prefetch = 0 : i64, scratch_operands = 0 : i64, tpu.core_type = #tpu.core_type<tc>, window_params = [{transform_indices = @transform_0, window_bounds = array<i64: 2, 52, 16>}, {pipeline_mode = #tpu.pipeline_mode<synchronous>, transform_indices = @transform_1, window_bounds = array<i64: 52, 1>}, {pipeline_mode = #tpu.pipeline_mode<synchronous>, transform_indices = @transform_2, window_bounds = array<i64: 1, 1>}, {transform_indices = @transform_3, window_bounds = array<i64: 2, 16>}]} {
    %c0 = arith.constant 0 : index
    %c0_0 = arith.constant 0 : index
    %c0_1 = arith.constant 0 : index
    %0 = vector.load %arg1[%c0, %c0_0, %c0_1] : memref<2x52x16xf32, #tpu.memory_space<vmem>>, vector<2x52x16xf32>
    %c0_2 = arith.constant 0 : index
    %c0_3 = arith.constant 0 : index
    %1 = vector.load %arg2[%c0_2, %c0_3] : memref<52x1xf32, #tpu.memory_space<vmem>>, vector<52x1xf32>
    %2 = vector.shape_cast %1 : vector<52x1xf32> to vector<1x52x1xf32>
    %3 = vector.broadcast %2 : vector<1x52x1xf32> to vector<2x52x16xf32>
    %4 = arith.mulf %0, %3 : vector<2x52x16xf32>
    %cst = arith.constant dense<0.000000e+00> : vector<2x16xf32>
    %5 = vector.multi_reduction <add>, %4, %cst [1] : vector<2x52x16xf32> to vector<2x16xf32>
    %c0_4 = arith.constant 0 : index
    %c0_5 = arith.constant 0 : index
    %6 = vector.load %arg3[%c0_4, %c0_5] : memref<1x1xf32, #tpu.memory_space<vmem>>, vector<1x1xf32>
    %7 = vector.broadcast %6 : vector<1x1xf32> to vector<2x16xf32>
    %8 = arith.addf %5, %7 : vector<2x16xf32>
    %c0_6 = arith.constant 0 : index
    %c0_7 = arith.constant 0 : index
    %9 = vector.load %arg4[%c0_6, %c0_7] : memref<2x16xf32, #tpu.memory_space<vmem>>, vector<2x16xf32>
    tpu.vector_store %arg4[%c0_6, %c0_7], %8 {strides = array<i32>} : memref<2x16xf32, #tpu.memory_space<vmem>>, vector<2x16xf32>,
    return
  }
  func.func @transform_0(%arg0: i32) -> (i32, i32, i32) {
    %c0_i32 = arith.constant 0 : i32
    %c0_i32_0 = arith.constant 0 : i32
    %c0_i32_1 = arith.constant 0 : i32
    return %c0_i32, %c0_i32_0, %arg0 : i32, i32, i32
  }
  func.func @transform_1(%arg0: i32) -> (i32, i32) {
    %c0_i32 = arith.constant 0 : i32
    %c0_i32_0 = arith.constant 0 : i32
    %c0_i32_1 = arith.constant 0 : i32
    return %c0_i32, %c0_i32_0 : i32, i32
  }
  func.func @transform_2(%arg0: i32) -> (i32, i32) {
    %c0_i32 = arith.constant 0 : i32
    %c0_i32_0 = arith.constant 0 : i32
    %c0_i32_1 = arith.constant 0 : i32
    return %c0_i32, %c0_i32_0 : i32, i32
  }
  func.func @transform_3(%arg0: i32) -> (i32, i32) {
    %c0_i32 = arith.constant 0 : i32
    %c0_i32_0 = arith.constant 0 : i32
    return %c0_i32, %arg0 : i32, i32
  }
}

</mosaic_0001>

<bundles_post_ra>
// kernel: tpu_custom_call.1
= control target key start
LH: loop header
LB: loop body
LE: loop exit
PB: predicated region body
PF: predicated region fallthrough
CT: control target
= control target key end

     0   :  { %s290_s0 = inlined_call_operand.vmem [shape: f32[2,52,16], index: 0, kind: input, shape index: {}]   ;;  %s291_s1 = inlined_call_operand.vmem [shape: f32[52,1], index: 1, kind: input, shape index: {}]   ;;  %s292_s2 = inlined_call_operand.<no memory space> [shape: f32[1,1], index: 2, kind: input, shape index: {}]   ;;  %s293_s3 = inlined_call_operand.hbm [shape: f32[2,16], index: 3, kind: output, shape index: {}]  }
   0x1   :  { %v8_v0 = vstv %s292_s2 }
   0x2   :  { %9 = vst [vmem:[#allocation2] sm:$0x1] %v8_v0 }
   0x3   :  { %v33_v1 = vld [vmem:[%s291_s1 + $0x10] sm:$0xff]  ;;  %v31_v2 = vld [vmem:[%s291_s1] sm:$0xff]  ;;  %v187_v3 = vmov 0   ;;  %v34_v4 = vld [vmem:[%s291_s1 + $0x18] sm:$0xff] }
   0x4   :  { %164 = vset.pattern.permute.xlu1 %v187_v3  ;;  %163 = vset.pattern.permute.xlu0 %v187_v3  ;;  %v32_v5 = vld [vmem:[%s291_s1 + $0x8] sm:$0xff] }
   0x5   :  { %50 = vperm.xlu1 %164, %v33_v1   ;;  %40 = vperm.xlu0 %163, %v31_v2  }
   0x9   :  { %55 = vperm.xlu1 %164, %v34_v4   ;;  %45 = vperm.xlu0 %163, %v32_v5  }
   0xa   :  { %10 = vsyncpa [#allocation4], 0  ;;  %v36_v6 = vld [vmem:[%s291_s1 + $0x28] sm:$0xff]  ;;  %v35_v7 = vld [vmem:[%s291_s1 + $0x20] sm:$0xff]  ;;  %vm87_vm0 = vcmask 130048   ;;  %vm99_vm1 = vcmask 125952  }
   0xb   :  { %v160_v8 = vld [vmem:[#allocation2] ss:$0 sm:$0xff]  ;;  %v37_v9 = vld [vmem:[%s291_s1 + $0x30] sm:$0xf]  ;;  %v24_v11 = vld [vmem:[%s290_s0 + $0x38] sm:$0xff]  ;;  %vm141_vm2 = vcmask 1041409  }
   0xc   :  { %v17_v10 = vld [vmem:[%s290_s0] sm:$0xff]  ;;  %v19_v14 = vld [vmem:[%s290_s0 + $0x10] sm:$0xff]  ;;  %v26_v15 = vld [vmem:[%s290_s0 + $0x48] sm:$0xff]  ;;  %vm144_vm3 = vcmask 123904  }
   0xd   :  { %65 = vperm.xlu1 %164, %v36_v6   ;;  %60 = vperm.xlu0 %163, %v35_v7   ;;  %v18_v18 = vld [vmem:[%s290_s0 + $0x8] sm:$0xff]  ;;  %v25_v19 = vld [vmem:[%s290_s0 + $0x40] sm:$0xff]  ;;  %v20_v21 = vld [vmem:[%s290_s0 + $0x18] sm:$0xff] }
   0xe   :  { %v27_v22 = vld [vmem:[%s290_s0 + $0x50] sm:$0xff]  ;;  %v21_v30 = vld [vmem:[%s290_s0 + $0x20] sm:$0xff]  ;;  %v28_v31 = vld [vmem:[%s290_s0 + $0x58] sm:$0xff] }
   0xf   :  { %v22_v39 = vld [vmem:[%s290_s0 + $0x28] sm:$0xff]  ;;  %v29_v40 = vld [vmem:[%s290_s0 + $0x60] sm:$0xff]  ;;  %v23_v48 = vld [vmem:[%s290_s0 + $0x30] sm:$0xf] }
  0x10   :  { %v30_v49 = vld [vmem:[%s290_s0 + $0x68] sm:$0xf]  ;;  %s188_s0 = smov [#allocation3]  }
  0x11   :  { %134 = vperm.xlu1 %164, %v160_v8   ;;  %70 = vperm.xlu0 %163, %v37_v9   ;;  %s152_s26 = sshll.u32 %s188_s0, 4  ;;  %s153_s26 = int_to_ptr.vmem [resolvable:$true] %s152_s26 }
  0x12   :  { %s165_s27 = scalar_lea.vmem %s153_s26, 32  ;;  %p170_p1 = scmp.lt.s32.totalorder %s153_s26, %s153_s26 }
  0x13   :  { %p166_p0 = scmp.ne.s32.totalorder %s153_s26, %s165_s27  ;;  %p171_p2 = scmp.lt.s32.totalorder %s165_s27, %s165_s27 }
  0x15   :  { %p172_p3 = por %p171_p2, %p170_p1 }
  0x17   :  { %p173_p4 = pnand %p172_p3, %p166_p0 }
  0x80   :  { %v51_v12 = vpop.permute.xlu1 %50  ;;  %v41_v13 = vpop.permute.xlu0 %40 }
  0x81   :  { %v73_v16 = vmul.f32 %v41_v13, %v17_v10  ;;  %v80_v17 = vmul.f32 %v41_v13, %v24_v11  ;;  %v75_v24 = vmul.f32 %v51_v12, %v19_v14  ;;  %v82_v25 = vmul.f32 %v51_v12, %v26_v15 }
  0x83   :  { %v88_v28 = vsel %vm87_vm0, %v73_v16, 0.0  ;;  %v108_v29 = vsel %vm87_vm0, %v80_v17, 0.0  ;;  %v91_v42 = vsel %vm87_vm0, %v75_v24, 0.0  ;;  %v111_v43 = vsel %vm87_vm0, %v82_v25, 0.0 }
  0x84   :  { %v56_v20 = vpop.permute.xlu1 %55  ;;  %v46_v23 = vpop.permute.xlu0 %45 }
  0x85   :  { %v74_v26 = vmul.f32 %v46_v23, %v18_v18  ;;  %v81_v27 = vmul.f32 %v46_v23, %v25_v19  ;;  %v76_v32 = vmul.f32 %v56_v20, %v20_v21  ;;  %v83_v33 = vmul.f32 %v56_v20, %v27_v22 }
  0x87   :  { %v89_v34 = vsel %vm87_vm0, %v74_v26, 0.0  ;;  %v109_v35 = vsel %vm87_vm0, %v81_v27, 0.0  ;;  %v93_v50 = vsel %vm87_vm0, %v76_v32, 0.0  ;;  %v113_v51 = vsel %vm87_vm0, %v83_v33, 0.0 }
  0x88   :  { %v90_v36 = vadd.f32 %v89_v34, %v88_v28  ;;  %v110_v37 = vadd.f32 %v109_v35, %v108_v29  ;;  %v66_v38 = vpop.permute.xlu1 %65  ;;  %v61_v41 = vpop.permute.xlu0 %60 }
  0x89   :  { %v77_v44 = vmul.f32 %v61_v41, %v21_v30  ;;  %v84_v45 = vmul.f32 %v61_v41, %v28_v31  ;;  %v78_v52 = vmul.f32 %v66_v38, %v22_v39  ;;  %v85_v53 = vmul.f32 %v66_v38, %v29_v40 }
  0x8a   :  { %v92_v46 = vadd.f32 %v91_v42, %v90_v36  ;;  %v112_v47 = vadd.f32 %v111_v43, %v110_v37 }
  0x8b   :  { %v95_v57 = vsel %vm87_vm0, %v77_v44, 0.0  ;;  %v115_v58 = vsel %vm87_vm0, %v84_v45, 0.0  ;;  %v97_v63 = vsel %vm87_vm0, %v78_v52, 0.0  ;;  %v117_v0 = vsel %vm87_vm0, %v85_v53, 0.0 }
  0x8c   :  { %v94_v54 = vadd.f32 %v93_v50, %v92_v46  ;;  %v114_v55 = vadd.f32 %v113_v51, %v112_v47  ;;  %v71_v56 = vpop.permute.xlu0 %70  ;;  %v135_v19 = vpop.permute.xlu1 %134 }
  0x8d   :  { %v79_v59 = vmul.f32 %v71_v56, %v23_v48  ;;  %v86_v60 = vmul.f32 %v71_v56, %v30_v49 }
  0x8e   :  { %v96_v61 = vadd.f32 %v95_v57, %v94_v54  ;;  %v116_v62 = vadd.f32 %v115_v58, %v114_v55 }
  0x8f   :  { %v100_v3 = vsel %vm99_vm1, %v79_v59, 0.0  ;;  %v119_v4 = vsel %vm99_vm1, %v86_v60, 0.0 }
  0x90   :  { %v98_v1 = vadd.f32 %v97_v63, %v96_v61  ;;  %v118_v2 = vadd.f32 %v117_v0, %v116_v62 }
  0x92   :  { %v101_v5 = vadd.f32 %v100_v3, %v98_v1  ;;  %v120_v6 = vadd.f32 %v119_v4, %v118_v2 }
  0x94   :  { %v102_v7 = vrot.slane %v101_v5, 4  ;;  %v121_v8 = vrot.slane %v120_v6, 4 }
  0x96   :  { %v103_v9 = vadd.f32 %v102_v7, %v101_v5  ;;  %v122_v10 = vadd.f32 %v121_v8, %v120_v6 }
  0x98   :  { %v104_v11 = vrot.slane %v103_v9, 2  ;;  %v123_v12 = vrot.slane %v122_v10, 2 }
  0x9a   :  { %v105_v13 = vadd.f32 %v104_v11, %v103_v9  ;;  %v124_v14 = vadd.f32 %v123_v12, %v122_v10 }
  0x9c   :  { %v106_v15 = vrot.slane %v105_v13, 1  ;;  %v125_v16 = vrot.slane %v124_v14, 1 }
  0x9e   :  { %v107_v17 = vadd.f32 %v106_v15, %v105_v13  ;;  %v126_v18 = vadd.f32 %v125_v16, %v124_v14 }
  0xa0   :  { %v137_v20 = vadd.f32 %v135_v19, %v107_v17  ;;  %v138_v21 = vadd.f32 %v135_v19, %v126_v18 }
  0xa2   :  { %v142_v22 = vsel %vm141_vm2, %v138_v21, %v137_v20 }
  0xa3   :  { %145 = vst.msk [vmem:[#allocation3] sm:$0x3] %vm144_vm3, %v142_v22 }
  0xa4   :  { %176 = shalt.err (!%p173_p4)
}
  0xa5   :  { %155 = dma.vmem_to_hbm [thread:$0]  %s153_s26, 32, %s293_s3, [#allocation4]  }
  0xa6   :  { %185 = dma.done.wait [#allocation4], 32  }
  0xa7   :  { %186 = vsyncadd [#allocation4], 4294967264 }
  0xa8   :  { %159 = vsyncpa [#allocation4], 1 }

</bundles_post_ra>
